<compile_context>
chip_gen: v7x
topology: tpu7x:2x2x1
jax: 0.10.0
libtpu: 0.0.40
codegen_flags: <defaults>
</compile_context>

<pallas_src>
import jax
import jax.numpy as jnp
from jax import lax
from jax.experimental import pallas as pl
from jax.experimental.pallas import tpu as pltpu


def _round_up(n: int, m: int) -> int:
    return ((n + m - 1) // m) * m


def _ffnn_kernel(x_ref, w1_ref, b1_ref, w2_ref, b2_ref, out_ref):
    # Cast the x tile to bf16 in-kernel (hidden under the x DMA; wrapper stays f32).
    x_bf = x_ref[...].astype(w1_ref.dtype)                       # (TB, D) bf16

    # fc1 on the MXU with a lane-dense result: contract D of (H, D) and (TB, D) -> (H, TB).
    hidden = lax.dot_general(
        w1_ref[...], x_bf,
        dimension_numbers=(((1,), (1,)), ((), ())),
        preferred_element_type=jnp.float32,
    )                                                            # (H, TB) f32
    relu = jnp.maximum(hidden + b1_ref[...], 0.0)                # + (H, 1) bias, f32 VPU

    # fc2 as a sublane-weighted reduce (VPU multiply + XLU reduce), no M=1 MXU matmul.
    logits = jnp.sum(relu * w2_ref[...], axis=0, keepdims=True)  # (1, TB) f32
    logits = logits + b2_ref[0]                                  # scalar bias from SMEM

    # Sigmoid: exp + approximate reciprocal both run on the EUP slot.
    out_ref[...] = pl.reciprocal(1.0 + jnp.exp(-logits), approx=True).astype(out_ref.dtype)


def feedforward_nn_pallas(x, fc1_w, fc1_b, fc2_w, fc2_b, *,
                          block_b=16384, mxu_dtype=jnp.bfloat16):
    """Forward pass of feedforward_nn: sigmoid(relu(x @ W1^T + b1) @ W2^T + b2).

    Returns (B, 1) float32, matching the PyTorch module.
    """
    B, D = x.shape
    H, D2 = fc1_w.shape
    assert D2 == D and fc2_w.shape == (1, H)

    # Parameters are tiny; one-time casts/reshapes in the wrapper are negligible.
    w1t = jnp.asarray(fc1_w, mxu_dtype)                    # (H, D), torch-native layout
    b1 = jnp.asarray(fc1_b, jnp.float32).reshape(H, 1)     # column: broadcasts over lanes
    w2 = jnp.asarray(fc2_w, jnp.float32).reshape(H, 1)     # column: broadcasts over lanes
    b2 = jnp.asarray(fc2_b, jnp.float32).reshape(1)

    # Batch tile: multiple of 128 so the (1, TB) output block is lane-dense.
    TB = min(_round_up(block_b, 128), _round_up(B, 128))
    nb = pl.cdiv(B, TB)
    Bp = nb * TB

    x_in = x
    if B < TB:
        # Tiny-batch case only: pad the (small) array so the single block is in-bounds.
        x_in = jnp.pad(x, ((0, TB - B), (0, 0)))
    # For B >= TB with B % TB != 0, the last x block is a partial boundary block: Pallas
    # masks the DMA, the garbage trailing columns it produces never contaminate valid
    # columns (column j depends only on row j of x) and are sliced off below.  The output
    # is padded to Bp so all output stores stay in-bounds.

    out = pl.pallas_call(
        _ffnn_kernel,
        out_shape=jax.ShapeDtypeStruct((1, Bp), jnp.float32),
        grid=(nb,),
        in_specs=[
            pl.BlockSpec((TB, D), lambda i: (i, 0)),             # x tile, pipelined over batch
            pl.BlockSpec((H, D), lambda i: (0, 0)),              # fc1 weight, VMEM-resident
            pl.BlockSpec((H, 1), lambda i: (0, 0)),              # fc1 bias column
            pl.BlockSpec((H, 1), lambda i: (0, 0)),              # fc2 weight column
            pl.BlockSpec(memory_space=pltpu.MemorySpace.SMEM),   # fc2 bias scalar
        ],
        out_specs=pl.BlockSpec((1, TB), lambda i: (0, i)),       # lane-dense output row
        compiler_params=pltpu.CompilerParams(
            dimension_semantics=("parallel",),                   # megacore sharding on v7x
            vmem_limit_bytes=48 * 1024 * 1024,                   # fits v7x's 64 MiB VMEM
        ),
    )(x_in, w1t, b1, w2, b2)

    # (1, Bp) lane-dense row -> (B, 1) column, dropping any batch padding.
    return out[0, :B].reshape(B, 1).astype(x.dtype)


def _reference(x, fc1_w, fc1_b, fc2_w, fc2_b):
    # Pure f32 JAX reference matching the torch module.
    h = jnp.maximum(x @ fc1_w.T + fc1_b, 0.0)
    return jax.nn.sigmoid(h @ fc2_w.T + fc2_b)


if __name__ == "__main__":
    input_size = 16
    hidden_size = 32
    batch = 8

    key = jax.random.PRNGKey(0)
    kx, kw1, kb1, kw2, kb2 = jax.random.split(key, 5)

    x = jax.random.normal(kx, (batch, input_size), dtype=jnp.float32)
    # Deterministic init mimicking nn.Linear's uniform(-1/sqrt(fan_in), 1/sqrt(fan_in)).
    lim1 = 1.0 / float(input_size) ** 0.5
    lim2 = 1.0 / float(hidden_size) ** 0.5
    fc1_w = jax.random.uniform(kw1, (hidden_size, input_size), jnp.float32, -lim1, lim1)
    fc1_b = jax.random.uniform(kb1, (hidden_size,), jnp.float32, -lim1, lim1)
    fc2_w = jax.random.uniform(kw2, (1, hidden_size), jnp.float32, -lim2, lim2)
    fc2_b = jax.random.uniform(kb2, (1,), jnp.float32, -lim2, lim2)

    y = feedforward_nn_pallas(x, fc1_w, fc1_b, fc2_w, fc2_b)
    y = jax.block_until_ready(y)

    y_ref = _reference(x, fc1_w, fc1_b, fc2_w, fc2_b)
    assert y.shape == (batch, 1)
    err = float(jnp.max(jnp.abs(y - y_ref)))
    # bf16 MXU operands + approx reciprocal vs pure-f32 torch numerics: well under 5e-3.
    assert err < 5e-3, f"max abs err = {err}"

    print("KERNEL_OK")
</pallas_src>

<mosaic_0001>
module attributes {stable_mosaic.version = 11 : i64} {
  func.func @_ffnn_kernel(%arg0: i32, %arg1: memref<128x16xf32, #tpu.memory_space<vmem>>, %arg2: memref<32x16xbf16, #tpu.memory_space<vmem>>, %arg3: memref<32x1xf32, #tpu.memory_space<vmem>>, %arg4: memref<32x1xf32, #tpu.memory_space<vmem>>, %arg5: memref<1xf32, #tpu.memory_space<smem>>, %arg6: memref<1x128xf32, #tpu.memory_space<vmem>>) attributes {dimension_semantics = [#tpu.dimension_semantics<parallel>], iteration_bounds = array<i64: 1>, scalar_prefetch = 0 : i64, scratch_operands = 0 : i64, tpu.core_type = #tpu.core_type<tc>, window_params = [{transform_indices = @transform_0, window_bounds = array<i64: 128, 16>}, {pipeline_mode = #tpu.pipeline_mode<synchronous>, transform_indices = @transform_1, window_bounds = array<i64: 32, 16>}, {pipeline_mode = #tpu.pipeline_mode<synchronous>, transform_indices = @transform_2, window_bounds = array<i64: 32, 1>}, {pipeline_mode = #tpu.pipeline_mode<synchronous>, transform_indices = @transform_3, window_bounds = array<i64: 32, 1>}, {transform_indices = @transform_4, window_bounds = array<i64: 1>}, {transform_indices = @transform_5, window_bounds = array<i64: 1, 128>}]} {
    %c0 = arith.constant 0 : index
    %c0_0 = arith.constant 0 : index
    %0 = vector.load %arg1[%c0, %c0_0] : memref<128x16xf32, #tpu.memory_space<vmem>>, vector<128x16xf32>
    %1 = arith.truncf %0 : vector<128x16xf32> to vector<128x16xbf16>
    %c0_1 = arith.constant 0 : index
    %c0_2 = arith.constant 0 : index
    %2 = vector.load %arg2[%c0_1, %c0_2] : memref<32x16xbf16, #tpu.memory_space<vmem>>, vector<32x16xbf16>
    %cst = arith.constant dense<0.000000e+00> : vector<32x128xf32>
    %3 = tpu.matmul %2, %1, %cst {dimension_numbers = #tpu.dot_dimension_numbers<[1], [1], [0], [0], [0, 0, 1, 0], [], []>} : vector<32x16xbf16>, vector<128x16xbf16>, vector<32x128xf32> -> vector<32x128xf32>
    %c0_3 = arith.constant 0 : index
    %c0_4 = arith.constant 0 : index
    %4 = vector.load %arg3[%c0_3, %c0_4] : memref<32x1xf32, #tpu.memory_space<vmem>>, vector<32x1xf32>
    %5 = vector.broadcast %4 : vector<32x1xf32> to vector<32x128xf32>
    %6 = arith.addf %3, %5 : vector<32x128xf32>
    %cst_5 = arith.constant 0.000000e+00 : f32
    %7 = vector.broadcast %cst_5 : f32 to vector<32x128xf32>
    %8 = arith.maximumf %6, %7 : vector<32x128xf32>
    %c0_6 = arith.constant 0 : index
    %c0_7 = arith.constant 0 : index
    %9 = vector.load %arg4[%c0_6, %c0_7] : memref<32x1xf32, #tpu.memory_space<vmem>>, vector<32x1xf32>
    %10 = vector.broadcast %9 : vector<32x1xf32> to vector<32x128xf32>
    %11 = arith.mulf %8, %10 : vector<32x128xf32>
    %cst_8 = arith.constant dense<0.000000e+00> : vector<128xf32>
    %12 = vector.multi_reduction <add>, %11, %cst_8 [0] : vector<32x128xf32> to vector<128xf32>
    %13 = vector.shape_cast %12 : vector<128xf32> to vector<1x128xf32>
    %c0_9 = arith.constant 0 : index
    %14 = memref.load %arg5[%c0_9] : memref<1xf32, #tpu.memory_space<smem>>
    %15 = vector.broadcast %14 : f32 to vector<1x128xf32>
    %16 = arith.addf %13, %15 : vector<1x128xf32>
    %cst_10 = arith.constant 0.000000e+00 : f32
    %17 = vector.broadcast %cst_10 : f32 to vector<1x128xf32>
    %18 = arith.subf %17, %16 : vector<1x128xf32>
    %19 = math.exp %18 : vector<1x128xf32>
    %cst_11 = arith.constant 1.000000e+00 : f32
    %20 = vector.broadcast %cst_11 : f32 to vector<1x128xf32>
    %21 = arith.addf %20, %19 : vector<1x128xf32>
    %22 = tpu.reciprocal %21 {approx = true} : vector<1x128xf32> -> vector<1x128xf32>
    %c0_12 = arith.constant 0 : index
    %c0_13 = arith.constant 0 : index
    %23 = vector.load %arg6[%c0_12, %c0_13] : memref<1x128xf32, #tpu.memory_space<vmem>>, vector<1x128xf32>
    tpu.vector_store %arg6[%c0_12, %c0_13], %22 {strides = array<i32>} : memref<1x128xf32, #tpu.memory_space<vmem>>, vector<1x128xf32>,
    return
  }
  func.func @transform_0(%arg0: i32) -> (i32, i32) {
    %c0_i32 = arith.constant 0 : i32
    %c0_i32_0 = arith.constant 0 : i32
    return %arg0, %c0_i32 : i32, i32
  }
  func.func @transform_1(%arg0: i32) -> (i32, i32) {
    %c0_i32 = arith.constant 0 : i32
    %c0_i32_0 = arith.constant 0 : i32
    %c0_i32_1 = arith.constant 0 : i32
    return %c0_i32, %c0_i32_0 : i32, i32
  }
  func.func @transform_2(%arg0: i32) -> (i32, i32) {
    %c0_i32 = arith.constant 0 : i32
    %c0_i32_0 = arith.constant 0 : i32
    %c0_i32_1 = arith.constant 0 : i32
    return %c0_i32, %c0_i32_0 : i32, i32
  }
  func.func @transform_3(%arg0: i32) -> (i32, i32) {
    %c0_i32 = arith.constant 0 : i32
    %c0_i32_0 = arith.constant 0 : i32
    %c0_i32_1 = arith.constant 0 : i32
    return %c0_i32, %c0_i32_0 : i32, i32
  }
  func.func @transform_4(%arg0: i32) -> i32 {
    %c0_i32 = arith.constant 0 : i32
    %c0_i32_0 = arith.constant 0 : i32
    return %c0_i32 : i32
  }
  func.func @transform_5(%arg0: i32) -> (i32, i32) {
    %c0_i32 = arith.constant 0 : i32
    %c0_i32_0 = arith.constant 0 : i32
    return %c0_i32, %arg0 : i32, i32
  }
}

</mosaic_0001>

<bundles_post_ra>
// kernel: tpu_custom_call.1
= control target key start
LH: loop header
LB: loop body
LE: loop exit
PB: predicated region body
PF: predicated region fallthrough
CT: control target
= control target key end

     0   :  { %vm85_vm0 = vcmask 130048   ;;  %v305_v5 = vmov 0   ;;  %s448_s0 = inlined_call_operand.vmem [shape: f32[128,16], index: 0, kind: input, shape index: {}]   ;;  %s449_s1 = inlined_call_operand.vmem [shape: bf16[32,16], index: 1, kind: input, shape index: {}]   ;;  %s450_s2 = inlined_call_operand.vmem [shape: f32[32,1], index: 2, kind: input, shape index: {}]   ;;  %s451_s3 = inlined_call_operand.vmem [shape: f32[32,1], index: 3, kind: input, shape index: {}]   ;;  %s452_s4 = inlined_call_operand.<no memory space> [shape: f32[1], index: 4, kind: input, shape index: {}]   ;;  %s453_s5 = inlined_call_operand.hbm [shape: f32[1,128], index: 5, kind: output, shape index: {}]  }
   0x1   :  { %v23_v0 = vld [vmem:[%s448_s0] sm:$0xff]  ;;  %v24_v1 = vld [vmem:[%s448_s0 + $0x8] sm:$0xff]  ;;  %v25_v2 = vld [vmem:[%s448_s0 + $0x10] sm:$0xff]  ;;  %273 = vset.pattern.permute.xlu0 %v305_v5  ;;  %274 = vset.pattern.permute.xlu1 %v305_v5 }
   0x2   :  { %v39_v3 = vpack.c.bf16 %v24_v1, %v23_v0  ;;  %v26_v4 = vld [vmem:[%s448_s0 + $0x18] sm:$0xff]  ;;  %v27_v8 = vld [vmem:[%s448_s0 + $0x20] sm:$0xff]  ;;  %v28_v9 = vld [vmem:[%s448_s0 + $0x28] sm:$0xff] }
   0x3   :  { %v40_v6 = vpack.c.bf16 %v26_v4, %v25_v2  ;;  %v275_v10 = vld [vmem:[%s449_s1] sm:$0xff]   ;;  %v53_v12 = vld [vmem:[%s450_s2 + $0x10] sm:$0xff]  ;;  %v41_v14 = vpack.c.bf16 %v28_v9, %v27_v8  ;;  %v52_v15 = vld [vmem:[%s450_s2 + $0x8] sm:$0xff] }
   0x4   :  { %263 = vmatprep.subr.msk.bf16.mxu0 %vm85_vm0, %v39_v3  ;;  %v93_v7 = vsel %vm85_vm0, %v39_v3, 0  ;;  %v51_v11 = vld [vmem:[%s450_s2] sm:$0xff]  ;;  %259 = vmatprep.mubr.msk.bf16.mxu0 %vm85_vm0, %v275_v10  ;;  %v54_v16 = vld [vmem:[%s450_s2 + $0x18] sm:$0xff] }
   0x5   :  { %244 = vmatpush3.bf16.xpose.msra.mxu0 %v93_v7  ;;  %57 = vperm.xlu0 %273, %v51_v11   ;;  %v96_v13 = vsel %vm85_vm0, %v40_v6, 0 }
   0x6   :  { %264 = vmatprep.subr.msk.bf16.mxu0 %vm85_vm0, %v40_v6  ;;  %67 = vperm.xlu1 %274, %v53_v12  }
   0x7   :  { %11 = vsyncpa [#allocation4], 0  ;;  %v169_v17 = vld [vmem:[%s451_s3] sm:$0xff]  ;;  %v29_v18 = vld [vmem:[%s448_s0 + $0x30] sm:$0xff]  ;;  %v99_v21 = vsel %vm85_vm0, %v41_v14, 0  ;;  %v207_v11 = vstv %s452_s4  ;;  %s306_s18 = smov [#allocation3]  }
   0x8   :  { %v30_v19 = vld [vmem:[%s448_s0 + $0x38] sm:$0xff]  ;;  %v170_v20 = vld [vmem:[%s451_s3 + $0x8] sm:$0xff]  ;;  %v171_v23 = vld [vmem:[%s451_s3 + $0x10] sm:$0xff]  ;;  %s221_s19 = sshll.u32 %s306_s18, 4  ;;  %s222_s19 = int_to_ptr.vmem [resolvable:$true] %s221_s19 }
   0x9   :  { %62 = vperm.xlu0 %273, %v52_v15   ;;  %v42_v22 = vpack.c.bf16 %v30_v19, %v29_v18  ;;  %v172_v24 = vld [vmem:[%s451_s3 + $0x18] sm:$0xff]  ;;  %v31_v25 = vld [vmem:[%s448_s0 + $0x40] sm:$0xff]  ;;  %v32_v26 = vld [vmem:[%s448_s0 + $0x48] sm:$0xff]  ;;  %s281_s20 = scalar_lea.vmem %s222_s19, 16  ;;  %s285_s21 = scalar_lea.vmem %s222_s19, 32 }
   0xa   :  { %72 = vperm.xlu1 %274, %v54_v16   ;;  %v43_v28 = vpack.c.bf16 %v32_v26, %v31_v25  ;;  %v33_v29 = vld [vmem:[%s448_s0 + $0x50] sm:$0xff]  ;;  %v34_v30 = vld [vmem:[%s448_s0 + $0x58] sm:$0xff]  ;;  %v35_v33 = vld [vmem:[%s448_s0 + $0x60] sm:$0xff]  ;;  %p282_p0 = scmp.ne.s32.totalorder %s222_s19, %s281_s20  ;;  %p286_p1 = scmp.lt.s32.totalorder %s222_s19, %s222_s19 }
   0xb   :  { %v102_v27 = vsel %vm85_vm0, %v42_v22, 0  ;;  %v44_v32 = vpack.c.bf16 %v34_v30, %v33_v29  ;;  %v36_v34 = vld [vmem:[%s448_s0 + $0x68] sm:$0xff]  ;;  %v37_v37 = vld [vmem:[%s448_s0 + $0x70] sm:$0xff]  ;;  %v38_v38 = vld [vmem:[%s448_s0 + $0x78] sm:$0xff]  ;;  %p287_p2 = scmp.lt.s32.totalorder %s285_s21, %s281_s20 }
   0xc   :  { %v105_v31 = vsel %vm85_vm0, %v43_v28, 0  ;;  %v45_v36 = vpack.c.bf16 %v36_v34, %v35_v33  ;;  %v46_v40 = vpack.c.bf16 %v38_v38, %v37_v37  ;;  %v276_v42 = vld [vmem:[%s449_s1 + $0x8] sm:$0xff]  }
   0xd   :  { %246 = vmatpush3.bf16.xpose.msra.mxu0 %v96_v13  ;;  %175 = vperm.xlu0 %273, %v169_v17   ;;  %v108_v35 = vsel %vm85_vm0, %v44_v32, 0  ;;  %p288_p3 = por %p287_p2, %p286_p1 }
   0xe   :  { %265 = vmatprep.subr.msk.bf16.mxu0 %vm85_vm0, %v41_v14  ;;  %180 = vperm.xlu1 %274, %v170_v20   ;;  %v111_v39 = vsel %vm85_vm0, %v45_v36, 0  ;;  %v114_v41 = vsel %vm85_vm0, %v46_v40, 0 }
   0xf   :  { %p289_p4 = pnand %p288_p3, %p282_p0 }
  0x11   :  { %185 = vperm.xlu0 %273, %v171_v23  }
  0x12   :  { %190 = vperm.xlu1 %274, %v172_v24  }
  0x15   :  { %248 = vmatpush3.bf16.xpose.msra.mxu0 %v99_v21 }
  0x16   :  { %266 = vmatprep.subr.msk.bf16.mxu0 %vm85_vm0, %v42_v22 }
  0x1d   :  { %250 = vmatpush3.bf16.xpose.msra.mxu0 %v102_v27 }
  0x1e   :  { %267 = vmatprep.subr.msk.bf16.mxu0 %vm85_vm0, %v43_v28 }
  0x25   :  { %252 = vmatpush3.bf16.xpose.msra.mxu0 %v105_v31 }
  0x26   :  { %268 = vmatprep.subr.msk.bf16.mxu0 %vm85_vm0, %v44_v32 }
  0x2d   :  { %254 = vmatpush3.bf16.xpose.msra.mxu0 %v108_v35 }
  0x2e   :  { %269 = vmatprep.subr.msk.bf16.mxu0 %vm85_vm0, %v45_v36 }
  0x35   :  { %256 = vmatpush3.bf16.xpose.msra.mxu0 %v111_v39 }
  0x36   :  { %270 = vmatprep.subr.msk.bf16.mxu0 %vm85_vm0, %v46_v40 }
  0x3d   :  { %258 = vmatpush3.bf16.xpose.msra.mxu0 %v114_v41 }
  0x44   :  { %260 = vmatmul.mubr.msk.bf16.vlgmr.msra.gmra.mrb[0].mxu0 %vm85_vm0, %v276_v42 }
  0x84   :  { %v58_v43 = vpop.permute.xlu0 %57 }
  0x85   :  { %v68_v44 = vpop.permute.xlu1 %67 }
  0x88   :  { %v63_v45 = vpop.permute.xlu0 %62 }
  0x89   :  { %v73_v46 = vpop.permute.xlu1 %72 }
  0x8c   :  { %v176_v52 = vpop.permute.xlu0 %175 }
  0x8d   :  { %v181_v57 = vpop.permute.xlu1 %180 }
  0x90   :  { %v186_v63 = vpop.permute.xlu0 %185 }
  0x91   :  { %v191_v2 = vpop.permute.xlu1 %190 }
 0x117   :  { %v261_v47 = vpop.f32.mrb[0].mxu0 }
 0x118   :  { %v150_v48 = vpop.f32.mrb[1].mxu0  ;;  %v159_v49 = vadd.f32 %v261_v47, %v68_v44 }
 0x119   :  { %v151_v50 = vadd.f32 %v150_v48, %v58_v43  ;;  %v262_v51 = vpop.f32.mrb[2].mxu0 }
 0x11a   :  { %v153_v53 = vpop.f32.mrb[3].mxu0  ;;  %v162_v55 = vadd.f32 %v262_v51, %v73_v46  ;;  %v167_v58 = vmax.f32 %v159_v49, 0.0 }
 0x11b   :  { %v165_v54 = vmax.f32 %v151_v50, 0.0  ;;  %v154_v56 = vadd.f32 %v153_v53, %v63_v45 }
 0x11c   :  { %v168_v61 = vmax.f32 %v162_v55, 0.0  ;;  %v195_v0 = vmul.f32 %v186_v63, %v167_v58 }
 0x11d   :  { %v166_v59 = vmax.f32 %v154_v56, 0.0  ;;  %v193_v60 = vmul.f32 %v176_v52, %v165_v54 }
 0x11e   :  { %v196_v3 = vmul.f32 %v191_v2, %v168_v61 }
 0x11f   :  { %v194_v62 = vmul.f32 %v181_v57, %v166_v59 }
 0x121   :  { %v197_v1 = vadd.f32 %v194_v62, %v193_v60 }
 0x123   :  { %v198_v4 = vadd.f32 %v197_v1, %v195_v0 }
 0x125   :  { %v199_v5 = vadd.f32 %v198_v4, %v196_v3 }
 0x127   :  { %v200_v6 = vrot.slane %v199_v5, 4 }
 0x129   :  { %v201_v7 = vadd.f32 %v200_v6, %v199_v5 }
 0x12b   :  { %v202_v8 = vrot.slane %v201_v7, 2 }
 0x12d   :  { %v203_v9 = vadd.f32 %v202_v8, %v201_v7 }
 0x12f   :  { %v204_v10 = vrot.slane %v203_v9, 1 }
 0x131   :  { %v205_v12 = vadd.f32 %v204_v10, %v203_v9 }
 0x133   :  { %v208_v13 = vadd.f32 %v207_v11, %v205_v12 }
 0x135   :  { %v209_v14 = vsub.f32 0.0, %v208_v13 }
 0x137   :  { %v210_v15 = vmul.f32 1.442695, %v209_v14 }
 0x139   :  { %277 = vpow2.f32 %v210_v15 }
 0x143   :  { %v278_v16 = vpop.eup %277 }
 0x144   :  { %v212_v17 = vadd.f32 1.0, %v278_v16 }
 0x146   :  { %279 = vrcp.f32 %v212_v17 }
 0x150   :  { %v280_v18 = vpop.eup %279 }
 0x151   :  { %214 = vst [vmem:[#allocation3] sm:$0x1] %v280_v18 }
 0x152   :  { %292 = shalt.err (!%p289_p4)
}
 0x153   :  { %s293_s22 = scalar_lea.hbm %s453_s5, 16 }
 0x154   :  { %p294_p5 = scmp.ne.s32.totalorder %s453_s5, %s293_s22  ;;  %p297_p6 = scmp.lt.u32.totalorder %s293_s22, %s453_s5 }
 0x156   :  { %p299_p7 = pnand %p297_p6, %p294_p5 }
 0x158   :  { %302 = shalt.err (!%p299_p7)
}
 0x159   :  { %224 = dma.vmem_to_hbm [thread:$0]  %s222_s19, 16, %s453_s5, [#allocation4]  }
 0x15a   :  { %303 = dma.done.wait [#allocation4], 16  }
 0x15b   :  { %304 = vsyncadd [#allocation4], 4294967280 }
 0x15c   :  { %228 = vsyncpa [#allocation4], 1 }

</bundles_post_ra>
